<compile_context>
chip_gen: v5e
topology: v5e:2x2
jax: 0.10.0
libtpu: 0.0.40
codegen_flags: <defaults>
</compile_context>

<pallas_src>
import jax
import jax.numpy as jnp
from jax.experimental import pallas as pl
from jax.experimental.pallas import tpu as pltpu


def _round_up(n, m):
    return ((n + m - 1) // m) * m


def logistic_regression_kernel(x_ref, w_ref, b_ref, o_ref):
    # x_ref: (TB, Dp) f32 VMEM tile; w_ref: (1, Dp) f32 VMEM (resident);
    # b_ref: (1, 1) f32 SMEM scalar; o_ref: (TB, 1) f32 VMEM.
    x = x_ref[...]                                   # (TB, Dp)
    w = w_ref[...]                                   # (1, Dp) broadcasts over rows
    # VPU multiply + XLU lane reduce instead of an MXU matvec with N=1.
    logits = jnp.sum(x * w, axis=-1, keepdims=True) + b_ref[0, 0]   # (TB, 1)
    o_ref[...] = jax.nn.sigmoid(logits).astype(o_ref.dtype)


def logistic_regression(x, weight, bias, *, block_rows=512):
    """sigmoid(x @ weight.T + bias) for x:(B,D), weight:(1,D), bias:(1,) -> (B,1)."""
    B, D = x.shape

    # Pad feature dim to a lane multiple (zero padding is exact for a dot product).
    Dp = max(_round_up(D, 128), 128)

    # Batch tile: multiple of 8 sublanes, capped so 2 double-buffered x tiles
    # stay under ~12 MiB (safe on v5e's 16 MiB default scoped VMEM and leaves
    # plenty of headroom on v7x's 64 MiB physical VMEM).
    vmem_budget = 12 * 1024 * 1024
    tb_cap = max(8, (vmem_budget // (2 * Dp * 4)) // 8 * 8)
    TB = max(8, min(_round_up(block_rows, 8), tb_cap, _round_up(B, 8)))
    Bp = _round_up(B, TB)

    x_p = x
    if Bp != B or Dp != D:
        x_p = jnp.pad(x, ((0, Bp - B), (0, Dp - D)))
    w_p = weight if Dp == D else jnp.pad(weight, ((0, 0), (0, Dp - D)))
    b2d = bias.reshape(1, 1).astype(jnp.float32)

    # TODO(synk): for very large D (>~8K) add a second ("arbitrary") grid axis
    # over D with a VMEM accumulator + pl.when epilogue instead of one wide block.
    out = pl.pallas_call(
        logistic_regression_kernel,
        out_shape=jax.ShapeDtypeStruct((Bp, 1), jnp.float32),
        grid_spec=pltpu.PrefetchScalarGridSpec(
            num_scalar_prefetch=0,
            grid=(Bp // TB,),
            in_specs=[
                pl.BlockSpec((TB, Dp), lambda i: (i, 0)),            # x: batch-tiled
                pl.BlockSpec((1, Dp), lambda i: (0, 0)),             # weight: resident
                pl.BlockSpec(memory_space=pltpu.MemorySpace.SMEM),   # bias scalar
            ],
            out_specs=pl.BlockSpec((TB, 1), lambda i: (i, 0)),
        ),
        compiler_params=pltpu.CompilerParams(
            # Independent batch tiles -> shard across v7x's 2 TensorCores.
            dimension_semantics=("parallel",),
            vmem_limit_bytes=32 * 1024 * 1024,
        ),
    )(x_p, w_p, b2d)

    return out[:B]


if __name__ == "__main__":
    key = jax.random.PRNGKey(0)
    k_x, k_w, k_b = jax.random.split(key, 3)

    batch = 8
    input_dim = 32

    x = jax.random.normal(k_x, (batch, input_dim), dtype=jnp.float32)
    # deterministic init mimicking nn.Linear's U(-1/sqrt(fan_in), 1/sqrt(fan_in))
    bound = 1.0 / (input_dim ** 0.5)
    weight = jax.random.uniform(k_w, (1, input_dim), jnp.float32, -bound, bound)
    bias = jax.random.uniform(k_b, (1,), jnp.float32, -bound, bound)

    out = logistic_regression(x, weight, bias)
    out = jax.block_until_ready(out)

    # reference check in plain JAX
    ref = jax.nn.sigmoid(x @ weight.T + bias)
    assert out.shape == (batch, 1)
    assert jnp.allclose(out, ref, atol=1e-5, rtol=1e-5)

    print("KERNEL_OK")
</pallas_src>

<mosaic_0001>
module attributes {stable_mosaic.version = 11 : i64} {
  func.func @logistic_regression_kernel(%arg0: i32, %arg1: memref<8x128xf32, #tpu.memory_space<vmem>>, %arg2: memref<1x128xf32, #tpu.memory_space<vmem>>, %arg3: memref<1x1xf32, #tpu.memory_space<smem>>, %arg4: memref<8x1xf32, #tpu.memory_space<vmem>>) attributes {dimension_semantics = [#tpu.dimension_semantics<parallel>], iteration_bounds = array<i64: 1>, scalar_prefetch = 0 : i64, scratch_operands = 0 : i64, tpu.core_type = #tpu.core_type<tc>, window_params = [{transform_indices = @transform_0, window_bounds = array<i64: 8, 128>}, {pipeline_mode = #tpu.pipeline_mode<synchronous>, transform_indices = @transform_1, window_bounds = array<i64: 1, 128>}, {transform_indices = @transform_2, window_bounds = array<i64: 1, 1>}, {transform_indices = @transform_3, window_bounds = array<i64: 8, 1>}]} {
    %c0 = arith.constant 0 : index
    %c0_0 = arith.constant 0 : index
    %0 = vector.load %arg1[%c0, %c0_0] : memref<8x128xf32, #tpu.memory_space<vmem>>, vector<8x128xf32>
    %c0_1 = arith.constant 0 : index
    %c0_2 = arith.constant 0 : index
    %1 = vector.load %arg2[%c0_1, %c0_2] : memref<1x128xf32, #tpu.memory_space<vmem>>, vector<1x128xf32>
    %2 = vector.broadcast %1 : vector<1x128xf32> to vector<8x128xf32>
    %3 = arith.mulf %0, %2 : vector<8x128xf32>
    %cst = arith.constant dense<0.000000e+00> : vector<8xf32>
    %4 = vector.multi_reduction <add>, %3, %cst [1] : vector<8x128xf32> to vector<8xf32>
    %5 = vector.shape_cast %4 : vector<8xf32> to vector<8x1xf32>
    %c0_3 = arith.constant 0 : index
    %c0_4 = arith.constant 0 : index
    %6 = memref.load %arg3[%c0_3, %c0_4] : memref<1x1xf32, #tpu.memory_space<smem>>
    %7 = vector.broadcast %6 : f32 to vector<8x1xf32>
    %8 = arith.addf %5, %7 : vector<8x1xf32>
    %9 = arith.negf %8 : vector<8x1xf32>
    %10 = math.exp %9 : vector<8x1xf32>
    %cst_5 = arith.constant 1.000000e+00 : f32
    %11 = vector.broadcast %cst_5 : f32 to vector<8x1xf32>
    %12 = arith.addf %11, %10 : vector<8x1xf32>
    %13 = arith.divf %11, %12 : vector<8x1xf32>
    %c0_6 = arith.constant 0 : index
    %c0_7 = arith.constant 0 : index
    %14 = vector.load %arg4[%c0_6, %c0_7] : memref<8x1xf32, #tpu.memory_space<vmem>>, vector<8x1xf32>
    tpu.vector_store %arg4[%c0_6, %c0_7], %13 {strides = array<i32>} : memref<8x1xf32, #tpu.memory_space<vmem>>, vector<8x1xf32>,
    return
  }
  func.func @transform_0(%arg0: i32) -> (i32, i32) {
    %c0_i32 = arith.constant 0 : i32
    %c0_i32_0 = arith.constant 0 : i32
    return %arg0, %c0_i32 : i32, i32
  }
  func.func @transform_1(%arg0: i32) -> (i32, i32) {
    %c0_i32 = arith.constant 0 : i32
    %c0_i32_0 = arith.constant 0 : i32
    %c0_i32_1 = arith.constant 0 : i32
    return %c0_i32, %c0_i32_0 : i32, i32
  }
  func.func @transform_2(%arg0: i32) -> (i32, i32) {
    %c0_i32 = arith.constant 0 : i32
    %c0_i32_0 = arith.constant 0 : i32
    %c0_i32_1 = arith.constant 0 : i32
    return %c0_i32, %c0_i32_0 : i32, i32
  }
  func.func @transform_3(%arg0: i32) -> (i32, i32) {
    %c0_i32 = arith.constant 0 : i32
    %c0_i32_0 = arith.constant 0 : i32
    return %arg0, %c0_i32 : i32, i32
  }
}

</mosaic_0001>

<bundles_post_ra>
// kernel: tpu_custom_call.1
= control target key start
LH: loop header
LB: loop body
LE: loop exit
PB: predicated region body
PF: predicated region fallthrough
CT: control target
= control target key end

     0   :  { %9 = vsyncpa [#allocation4], 0  ;;  %s99_s15 = smov [#allocation3]   ;;  %s132_s0 = inlined_call_operand.hbm [shape: f32[8,128], index: 0, kind: input, shape index: {}]   ;;  %s133_s1 = inlined_call_operand.vmem [shape: f32[1,128], index: 1, kind: input, shape index: {}]   ;;  %s134_s2 = inlined_call_operand.<no memory space> [shape: f32[1,1], index: 2, kind: input, shape index: {}]   ;;  %s135_s3 = inlined_call_operand.vmem [shape: f32[8,1], index: 3, kind: output, shape index: {}]  }
   0x1   :  { %s15_s14 = sshll.u32 %s132_s0, 4  ;;  %s17_s16 = sshll.u32 %s99_s15, 4  ;;  %s16_s14 = int_to_ptr.hbm [resolvable:$true] %s15_s14  ;;  %s18_s16 = int_to_ptr.vmem [resolvable:$true] %s17_s16 }
   0x2   :  { %20 = dma.hbm_to_vmem [thread:$0]  %s16_s14, 128, %s18_s16, [#allocation4]  }
   0x3   :  { %97 = dma.done.wait [#allocation4], 128  }
   0x4   :  { %98 = vsyncadd [#allocation4], 4294967168  ;;  %v29_v0 = vld [vmem:[#allocation3] sm:$0xff]  ;;  %v38_v3 = vstv %s134_s2  ;;  %vm59_vm3 = vcmask 7168  }
   0x5   :  { %v68_v1 = vld [vmem:[%s133_s1] ss:$0 sm:$0xff] }
   0x6   :  { %v34_v2 = vmul.f32 %v68_v1, %v29_v0 }
   0x8   :  { %35 = vadd.xlane.f32.xlu0 %v34_v2 }
  0x7b   :  { %v36_v4 = vpop.xlane.xlu0 %35 }
  0x7c   :  { %v39_v5 = vadd.f32 %v38_v3, %v36_v4 }
  0x7e   :  { %v66_v6 = vmul.f32 -1.442695, %v39_v5 }
  0x80   :  { %69 = vpow2.f32 %v66_v6 }
  0x86   :  { %v70_v7 = vpop.eup %69 }
  0x87   :  { %v43_v8 = vadd.f32 1.0, %v70_v7 }
  0x89   :  { %71 = vrcp.f32 %v43_v8  ;;  %v55_v12 = vand.u32 2147483648, %v43_v8  ;;  %v53_v14 = vand.u32 2147483647, %v43_v8  ;;  %vm49_vm1 = vweird.f32 %v43_v8 }
  0x8b   :  { %v56_v16 = vor.u32 1.1754944e-38, %v55_v12  ;;  %vm54_vm4 = vcmp.eq.f32.partialorder %v53_v14, 8.507059e+37 }
  0x8f   :  { %v72_v9 = vpop.eup %71 }
  0x90   :  { %v45_v10 = vmul.f32 %v72_v9, %v43_v8  ;;  %vm50_vm0 = vweird.f32 %v72_v9 }
  0x91   :  { %vm51_vm2 = vmor %vm49_vm1, %vm50_vm0 }
  0x92   :  { %v46_v11 = vsub.f32 1.0, %v45_v10 }
  0x94   :  { %v47_v13 = vmul.f32 %v72_v9, %v46_v11 }
  0x96   :  { %v48_v15 = vadd.f32 %v72_v9, %v47_v13 }
  0x98   :  { %v52_v17 = vsel %vm51_vm2, %v72_v9, %v48_v15 }
  0x99   :  { %v57_v18 = vsel %vm54_vm4, %v56_v16, %v52_v17 }
  0x9a   :  { %60 = vst.msk [vmem:[%s135_s3] sm:$0xff] %vm59_vm3, %v57_v18 }
  0x9b   :  { %65 = vsyncpa [#allocation4], 1 }

</bundles_post_ra>
